<compile_context>
chip_gen: v7x
topology: tpu7x:2x2x1
jax: 0.10.0
libtpu: 0.0.40
codegen_flags: <defaults>
</compile_context>

<pallas_src>
import functools

import numpy as np
import jax
import jax.numpy as jnp
from jax.experimental import pallas as pl
from jax.experimental.pallas import tpu as pltpu

EPS = 1e-5
MAX_VALUE = 1.0
LANE = 128
SUBLANE = 8


# ---------------- tree helpers (mirror the torch module, plain python) ----
def _get_leaves_nodes(parent_to_children):
    parents, children = set(), set()
    for node in parent_to_children:
        parents.add(node)
        children.update(parent_to_children[node])
    children.add(0)
    leaves = sorted(children - parents)
    nodes = children | parents
    return leaves, nodes


def _postorder_traversal(nodes, root=1, order=None):
    if order is None:
        order = []
    if root in nodes:
        for child in nodes[root]:
            _postorder_traversal(nodes, root=child, order=order)
    order.append(root)
    return order


def build_propagation_matrix(parent_to_children, leaves, nodes, eps=EPS):
    """M such that lca_sums = base_leaf_values @ M (exact postorder semantics)."""
    num_nodes = len(nodes)
    L = len(leaves)
    M = np.zeros((L, num_nodes), dtype=np.float32)
    for i, leaf in enumerate(leaves):
        M[i, leaf] = 1.0
    leaf_set = set(leaves)
    for node in _postorder_traversal(parent_to_children):
        if node not in leaf_set:
            for child in parent_to_children[node]:
                M[:, node] += M[:, child]
            M[:, node] *= (1.0 - eps)
    return M


# ---------------- padding / sizing helpers --------------------------------
def _round_up(x, m):
    return (x + m - 1) // m * m


def pad_propagation_matrix(M_np):
    """Zero-pad M to lane-aligned (L_pad, nodes_pad) and cast to bf16 for the MXU."""
    L, num_nodes = M_np.shape
    L_pad = _round_up(L, LANE)
    nodes_pad = _round_up(num_nodes, LANE)
    Mp = np.zeros((L_pad, nodes_pad), dtype=np.float32)
    Mp[:L, :num_nodes] = M_np
    return jnp.asarray(Mp, dtype=jnp.bfloat16)


def _choose_tiles(n, l_pad, nodes_pad):
    # Node-axis tile: keep the double-buffered bf16 M block within ~16 MiB.
    m_budget = 16 << 20
    tile_nodes = (m_budget // (2 * 2 * l_pad)) // LANE * LANE
    tile_nodes = int(max(LANE, min(nodes_pad, tile_nodes)))
    # Batch tile: double-buffered f32 X + f32 out blocks + bf16 base scratch
    # within ~24 MiB (leaves headroom on v7x's 64 MiB physical VMEM).
    row_budget = 24 << 20
    per_row = 2 * 4 * l_pad + 2 * 4 * tile_nodes + 2 * l_pad
    tile_n = row_budget // per_row
    tile_n = int(max(SUBLANE, min(1024, (tile_n // SUBLANE) * SUBLANE)))
    tile_n = min(tile_n, _round_up(n, SUBLANE))
    return tile_n, tile_nodes


# ---------------- Pallas kernel -------------------------------------------
def _lca_kernel(x_ref, m_ref, o_ref, base_ref, *, num_leaves):
    # Compute per-row leaf base values once per batch tile (node-tile j == 0),
    # cache them (bf16) in VMEM scratch, and re-use for every node tile.
    @pl.when(pl.program_id(1) == 0)
    def _():
        x = x_ref[...].astype(jnp.float32)               # (TILE_N, L_pad)
        tn, l_pad = x.shape
        col = jax.lax.broadcasted_iota(jnp.int32, (tn, l_pad), 1)
        is_unc = col == 0                                # hoisted, reused 2x
        # real leaf columns 1..num_leaves-1 participate in the row max;
        # column 0 ("unclassified") and zero-padded lanes are excluded.
        in_max = jnp.logical_and(col >= 1, col < num_leaves)

        neg_inf = jnp.float32(-jnp.inf)
        row_max = jnp.max(jnp.where(in_max, x, neg_inf), axis=1, keepdims=True)
        # sum_leaves uses the REAL leaf count, not the padded lane width.
        sum_leaves = row_max * jnp.float32(num_leaves - 1)          # (TILE_N,1)

        # X - Xmax_excl_unc + max_value, ReLU (column 0 is not shifted).
        x_shift = jnp.where(is_unc, x, x - row_max) + MAX_VALUE
        x_relu = jnp.maximum(x_shift, 0.0)

        # per-leaf base values: leaf 0 -> eps*(x+1); others -> x * s/(s+eps)
        scale = sum_leaves * pl.reciprocal(sum_leaves + EPS, approx=True)
        base = jnp.where(is_unc, EPS * (x_relu + 1.0), x_relu * scale)
        base_ref[...] = base.astype(jnp.bfloat16)

    # Propagate leaf values up the tree (static linear map) on the MXU:
    # bf16 inputs, f32 accumulation. Padded M rows/cols are zero.
    o_ref[...] = jnp.dot(base_ref[...], m_ref[...],
                         preferred_element_type=jnp.float32)


def weighted_lca_forward(x, prop_matrix_padded, num_leaves, num_nodes):
    n, l = x.shape
    assert l == num_leaves, f"X expected to have {num_leaves} columns, got {l}"
    l_pad, nodes_pad = prop_matrix_padded.shape

    tile_n, tile_nodes = _choose_tiles(n, l_pad, nodes_pad)
    n_pad = _round_up(max(n, tile_n), tile_n)
    nodes_pad2 = _round_up(nodes_pad, tile_nodes)

    # lane-align X (zeros in padded rows/cols are harmless: padded columns are
    # masked out of the row max and padded M rows are zero).
    x_p = jnp.pad(x.astype(jnp.float32), ((0, n_pad - n), (0, l_pad - l)))
    m_p = prop_matrix_padded
    if nodes_pad2 != nodes_pad:
        m_p = jnp.pad(m_p, ((0, 0), (0, nodes_pad2 - nodes_pad)))

    grid = (n_pad // tile_n, nodes_pad2 // tile_nodes)
    kernel = functools.partial(_lca_kernel, num_leaves=num_leaves)

    # VMEM budget: double-buffered X / out / M blocks + bf16 base scratch.
    need = (2 * tile_n * 4 * l_pad            # X blocks (f32)
            + 2 * tile_n * 4 * tile_nodes     # out blocks (f32)
            + 2 * l_pad * tile_nodes * 2      # M blocks (bf16)
            + tile_n * l_pad * 2)             # base scratch (bf16)
    vmem_limit = int(min(60 << 20, max(32 << 20, int(1.25 * need))))

    out_p = pl.pallas_call(
        kernel,
        out_shape=jax.ShapeDtypeStruct((n_pad, nodes_pad2), jnp.float32),
        grid_spec=pltpu.PrefetchScalarGridSpec(
            num_scalar_prefetch=0,
            grid=grid,
            in_specs=[
                pl.BlockSpec((tile_n, l_pad), lambda i, j: (i, 0)),
                pl.BlockSpec((l_pad, tile_nodes), lambda i, j: (0, j)),
            ],
            out_specs=pl.BlockSpec((tile_n, tile_nodes), lambda i, j: (i, j)),
            scratch_shapes=[pltpu.VMEM((tile_n, l_pad), jnp.bfloat16)],
        ),
        compiler_params=pltpu.CompilerParams(
            # batch axis megacore-parallel; node axis sequential so the base
            # scratch computed at j == 0 is valid for all node tiles.
            dimension_semantics=("parallel", "arbitrary"),
            vmem_limit_bytes=vmem_limit,
        ),
    )(x_p, m_p)

    return out_p[:n, :num_nodes]


# ---------------- numpy reference (exact torch semantics) -----------------
def reference_forward(X, parent_to_children, leaves, nodes,
                      eps=EPS, max_value=MAX_VALUE):
    X = np.asarray(X, np.float32)
    N, L = X.shape
    row_max = X[:, 1:].max(axis=1)
    maxes_rep = np.repeat(row_max, L - 1).reshape(N, L - 1)
    sum_leaves = maxes_rep.sum(axis=1)
    Xm = np.zeros_like(X)
    Xm[:, 1:] = maxes_rep
    Xr = np.maximum(X - Xm + max_value, 0.0)
    lca = np.zeros((N, len(nodes)), np.float32)
    for i, leaf in enumerate(leaves):
        if leaf != 0:
            lca[:, leaf] = Xr[:, i] * (sum_leaves / (sum_leaves + eps))
        else:
            lca[:, leaf] = eps * (Xr[:, i] + 1.0)
    leaf_set = set(leaves)
    for node in _postorder_traversal(parent_to_children):
        if node not in leaf_set:
            for child in parent_to_children[node]:
                lca[:, node] += lca[:, child]
            lca[:, node] *= (1.0 - eps)
    return lca


if __name__ == "__main__":
    # deterministic synthetic taxonomy: node ids densely labeled 0..8
    parent_to_children = {1: [0, 2, 3], 2: [4, 5], 3: [6, 7, 8]}
    leaves, nodes = _get_leaves_nodes(parent_to_children)  # leaves=[0,4,5,6,7,8]
    num_leaves, num_nodes = len(leaves), len(nodes)

    M_np = build_propagation_matrix(parent_to_children, leaves, nodes)
    M_pad = pad_propagation_matrix(M_np)   # (128, 128) bf16, lane-dense

    key = jax.random.PRNGKey(0)
    N = 8
    X = jax.random.normal(key, (N, num_leaves), dtype=jnp.float32)

    out = weighted_lca_forward(X, M_pad, num_leaves, num_nodes)
    out = jax.block_until_ready(out)

    ref = reference_forward(np.asarray(X), parent_to_children, leaves, nodes)
    # bf16 MXU inputs with f32 accumulation -> relaxed (but comfortable) tolerance.
    np.testing.assert_allclose(np.asarray(out), ref, rtol=2e-2, atol=2e-2)

    print("KERNEL_OK")
</pallas_src>

<mosaic_0001>
module attributes {stable_mosaic.version = 11 : i64} {
  func.func @_lca_kernel(%arg0: i32, %arg1: i32, %arg2: memref<8x128xf32, #tpu.memory_space<vmem>>, %arg3: memref<128x128xbf16, #tpu.memory_space<vmem>>, %arg4: memref<8x128xf32, #tpu.memory_space<vmem>>, %arg5: memref<8x128xbf16, #tpu.memory_space<vmem>>) attributes {dimension_semantics = [#tpu.dimension_semantics<parallel>, #tpu.dimension_semantics<arbitrary>], iteration_bounds = array<i64: 1, 1>, scalar_prefetch = 0 : i64, scratch_operands = 1 : i64, tpu.core_type = #tpu.core_type<tc>, window_params = [{transform_indices = @transform_0, window_bounds = array<i64: 8, 128>}, {transform_indices = @transform_1, window_bounds = array<i64: 128, 128>}, {transform_indices = @transform_2, window_bounds = array<i64: 8, 128>}]} {
    %c0_i32 = arith.constant 0 : i32
    %0 = arith.cmpi eq, %arg1, %c0_i32 : i32
    %1 = arith.extui %0 : i1 to i32
    %c0_i32_0 = arith.constant 0 : i32
    %2 = arith.cmpi ne, %1, %c0_i32_0 : i32
    scf.if %2 {
      %c0_6 = arith.constant 0 : index
      %c0_7 = arith.constant 0 : index
      %7 = vector.load %arg2[%c0_6, %c0_7] : memref<8x128xf32, #tpu.memory_space<vmem>>, vector<8x128xf32>
      %8 = tpu.iota {dimensions = array<i32: 1>} : vector<8x128xi32>
      %c0_i32_8 = arith.constant 0 : i32
      %9 = vector.broadcast %c0_i32_8 : i32 to vector<8x128xi32>
      %10 = arith.cmpi eq, %8, %9 : vector<8x128xi32>
      %c1_i32 = arith.constant 1 : i32
      %11 = vector.broadcast %c1_i32 : i32 to vector<8x128xi32>
      %12 = arith.cmpi sge, %8, %11 : vector<8x128xi32>
      %c6_i32 = arith.constant 6 : i32
      %13 = vector.broadcast %c6_i32 : i32 to vector<8x128xi32>
      %14 = arith.cmpi slt, %8, %13 : vector<8x128xi32>
      %15 = arith.andi %12, %14 : vector<8x128xi1>
      %cst_9 = arith.constant 0xFF800000 : f32
      %16 = vector.broadcast %cst_9 : f32 to vector<8x128xf32>
      %17 = arith.select %15, %7, %16 : vector<8x128xi1>, vector<8x128xf32>
      %cst_10 = arith.constant dense<0xFF800000> : vector<8xf32>
      %18 = vector.multi_reduction <maximumf>, %17, %cst_10 [1] : vector<8x128xf32> to vector<8xf32>
      %19 = vector.shape_cast %18 : vector<8xf32> to vector<8x1xf32>
      %cst_11 = arith.constant 5.000000e+00 : f32
      %20 = vector.broadcast %cst_11 : f32 to vector<8x1xf32>
      %21 = arith.mulf %19, %20 : vector<8x1xf32>
      %22 = vector.broadcast %19 : vector<8x1xf32> to vector<8x128xf32>
      %23 = arith.subf %7, %22 : vector<8x128xf32>
      %24 = arith.select %10, %7, %23 : vector<8x128xi1>, vector<8x128xf32>
      %cst_12 = arith.constant 1.000000e+00 : f32
      %25 = vector.broadcast %cst_12 : f32 to vector<8x128xf32>
      %26 = arith.addf %24, %25 : vector<8x128xf32>
      %cst_13 = arith.constant 0.000000e+00 : f32
      %27 = vector.broadcast %cst_13 : f32 to vector<8x128xf32>
      %28 = arith.maximumf %26, %27 : vector<8x128xf32>
      %cst_14 = arith.constant 9.99999974E-6 : f32
      %29 = vector.broadcast %cst_14 : f32 to vector<8x1xf32>
      %30 = arith.addf %21, %29 : vector<8x1xf32>
      %31 = tpu.reciprocal %30 {approx = true} : vector<8x1xf32> -> vector<8x1xf32>
      %32 = arith.mulf %21, %31 : vector<8x1xf32>
      %cst_15 = arith.constant 1.000000e+00 : f32
      %33 = vector.broadcast %cst_15 : f32 to vector<8x128xf32>
      %34 = arith.addf %28, %33 : vector<8x128xf32>
      %cst_16 = arith.constant 9.99999974E-6 : f32
      %35 = vector.broadcast %cst_16 : f32 to vector<8x128xf32>
      %36 = arith.mulf %35, %34 : vector<8x128xf32>
      %37 = vector.broadcast %32 : vector<8x1xf32> to vector<8x128xf32>
      %38 = arith.mulf %28, %37 : vector<8x128xf32>
      %39 = arith.select %10, %36, %38 : vector<8x128xi1>, vector<8x128xf32>
      %40 = arith.truncf %39 : vector<8x128xf32> to vector<8x128xbf16>
      %c0_17 = arith.constant 0 : index
      %c0_18 = arith.constant 0 : index
      %41 = vector.load %arg5[%c0_17, %c0_18] : memref<8x128xbf16, #tpu.memory_space<vmem>>, vector<8x128xbf16>
      tpu.vector_store %arg5[%c0_17, %c0_18], %40 {strides = array<i32>} : memref<8x128xbf16, #tpu.memory_space<vmem>>, vector<8x128xbf16>,
    } else {
    }
    %c0 = arith.constant 0 : index
    %c0_1 = arith.constant 0 : index
    %3 = vector.load %arg5[%c0, %c0_1] : memref<8x128xbf16, #tpu.memory_space<vmem>>, vector<8x128xbf16>
    %c0_2 = arith.constant 0 : index
    %c0_3 = arith.constant 0 : index
    %4 = vector.load %arg3[%c0_2, %c0_3] : memref<128x128xbf16, #tpu.memory_space<vmem>>, vector<128x128xbf16>
    %cst = arith.constant dense<0.000000e+00> : vector<8x128xf32>
    %5 = tpu.matmul %3, %4, %cst {dimension_numbers = #tpu.dot_dimension_numbers<[1], [0], [0], [1], [0, 0, 1, 1], [], []>} : vector<8x128xbf16>, vector<128x128xbf16>, vector<8x128xf32> -> vector<8x128xf32>
    %c0_4 = arith.constant 0 : index
    %c0_5 = arith.constant 0 : index
    %6 = vector.load %arg4[%c0_4, %c0_5] : memref<8x128xf32, #tpu.memory_space<vmem>>, vector<8x128xf32>
    tpu.vector_store %arg4[%c0_4, %c0_5], %5 {strides = array<i32>} : memref<8x128xf32, #tpu.memory_space<vmem>>, vector<8x128xf32>,
    return
  }
  func.func @transform_0(%arg0: i32, %arg1: i32) -> (i32, i32) {
    %c0_i32 = arith.constant 0 : i32
    %c0_i32_0 = arith.constant 0 : i32
    return %arg0, %c0_i32 : i32, i32
  }
  func.func @transform_1(%arg0: i32, %arg1: i32) -> (i32, i32) {
    %c0_i32 = arith.constant 0 : i32
    %c0_i32_0 = arith.constant 0 : i32
    return %c0_i32, %arg1 : i32, i32
  }
  func.func @transform_2(%arg0: i32, %arg1: i32) -> (i32, i32) {
    %c0_i32 = arith.constant 0 : i32
    return %arg0, %arg1 : i32, i32
  }
}

</mosaic_0001>

<bundles_post_ra>
// kernel: tpu_custom_call.1
= control target key start
LH: loop header
LB: loop body
LE: loop exit
PB: predicated region body
PF: predicated region fallthrough
CT: control target
= control target key end

     0   :  { %7 = vsyncpa [#allocation4], 0  ;;  %s380_s0 = inlined_call_operand.hbm [shape: f32[8,128], index: 0, kind: input, shape index: {}]   ;;  %s381_s1 = inlined_call_operand.hbm [shape: bf16[128,128], index: 1, kind: input, shape index: {}]   ;;  %s382_s2 = inlined_call_operand.hbm [shape: f32[8,128], index: 2, kind: output, shape index: {}]  }
   0x1   :  { %8 = vsyncpa [#allocation7], 0 }
   0x2   :  { %9 = vsyncpa [#allocation5], 0  ;;  %s315_s9 = smov [#allocation3]   ;;  %s316_s11 = smov [#allocation6]  }
   0x3   :  { %s16_s10 = sshll.u32 %s315_s9, 4  ;;  %s25_s12 = sshll.u32 %s316_s11, 4  ;;  %s17_s10 = int_to_ptr.vmem [resolvable:$true] %s16_s10  ;;  %s337_s12 = int_to_ptr.vmem [resolvable:$true] %s25_s12 }
   0x4   :  { %s243_s15 = scalar_lea.hbm %s380_s0, 128 }
   0x5   :  { %p244_p0 = scmp.ne.s32.totalorder %s380_s0, %s243_s15  ;;  %p247_p1 = scmp.lt.u32.totalorder %s243_s15, %s380_s0 }
   0x7   :  { %p249_p2 = pnand %p247_p1, %p244_p0 }
   0x9   :  { %252 = shalt.err (!%p249_p2)
}
   0xa   :  { %s253_s20 = scalar_lea.vmem %s17_s10, 128  ;;  %p258_p4 = scmp.lt.s32.totalorder %s17_s10, %s17_s10 }
   0xb   :  { %p254_p3 = scmp.ne.s32.totalorder %s17_s10, %s253_s20  ;;  %p259_p5 = scmp.lt.s32.totalorder %s253_s20, %s253_s20 }
   0xd   :  { %p260_p6 = por %p259_p5, %p258_p4 }
   0xf   :  { %p261_p7 = pnand %p260_p6, %p254_p3 }
  0x11   :  { %264 = shalt.err (!%p261_p7)
}
  0x12   :  { %19 = dma.hbm_to_vmem [thread:$0]  %s380_s0, 128, %s17_s10, [#allocation4]  }
  0x13   :  { %s265_s25 = scalar_lea.hbm %s381_s1, 1024 }
  0x14   :  { %p266_p8 = scmp.ne.s32.totalorder %s381_s1, %s265_s25  ;;  %p269_p9 = scmp.lt.u32.totalorder %s265_s25, %s381_s1 }
  0x16   :  { %p271_p10 = pnand %p269_p9, %p266_p8 }
  0x18   :  { %274 = shalt.err (!%p271_p10)
}
  0x19   :  { %s275_s30 = scalar_lea.vmem %s337_s12, 1024  ;;  %p280_p12 = scmp.lt.s32.totalorder %s337_s12, %s337_s12 }
  0x1a   :  { %p276_p11 = scmp.ne.s32.totalorder %s337_s12, %s275_s30  ;;  %p281_p13 = scmp.lt.s32.totalorder %s275_s30, %s275_s30 }
  0x1c   :  { %p282_p0 = por %p281_p13, %p280_p12 }
  0x1e   :  { %p283_p1 = pnand %p282_p0, %p276_p11 }
  0x20   :  { %286 = shalt.err (!%p283_p1)
}
  0x21   :  { %s317_s0 = smov 64   ;;  %s318_s3 = smov 4  }
  0x22   :  { %31 = dma.hbm_to_vmem [thread:$0]  %s381_s1, 1024, %s337_s12, [#allocation7], %s317_s0, %s317_s0, %s318_s3  }
  0x23   :  { %309 = dma.done.wait [#allocation4], 128  }
  0x24   :  { %310 = vsyncadd [#allocation4], 4294967168 }
  0x25   :  { %311 = dma.done.wait [#allocation7], 1024  }
  0x26   :  { %312 = vsyncadd [#allocation7], 4294966272  ;;  %v44_v0 = vlaneseq  ;;  %v319_v1 = vmov 0.0   ;;  %v43_v3 = vld [vmem:[#allocation3] sm:$0xff]  ;;  %v233_v5 = vld [vmem:[#allocation6] sm:$0xff]   ;;  %vm320_vm3 = vmmov 0  }
  0x27   :  { %206 = vmatprep.subr.bf16.mxu0 %v319_v1  ;;  %v234_v6 = vld [vmem:[#allocation6 + $0x8] sm:$0xff]   ;;  %v235_v7 = vld [vmem:[#allocation6 + $0x10] sm:$0xff]   ;;  %v236_v8 = vld [vmem:[#allocation6 + $0x18] sm:$0xff]   ;;  %222 = vmatprep.mubr.msk.bf16.mxu0 %vm320_vm3, %v319_v1  ;;  %s321_s1 = smov [#allocation8]  }
  0x28   :  { %v45_v2 = vand.u32 127, %v44_v0  ;;  %207 = vmatpush3.bf16.msra.mxu0 %v233_v5  ;;  %v237_v9 = vld [vmem:[#allocation6 + $0x20] sm:$0xff]   ;;  %v238_v10 = vld [vmem:[#allocation6 + $0x28] sm:$0xff]   ;;  %v239_v11 = vld [vmem:[#allocation6 + $0x30] sm:$0xff]   ;;  %s179_s6 = sshll.u32 %s321_s1, 4  ;;  %s180_s6 = int_to_ptr.vmem [resolvable:$true] %s179_s6 }
  0x29   :  { %208 = vmatprep.subr.bf16.mxu0 %v319_v1  ;;  %v240_v12 = vld [vmem:[#allocation6 + $0x38] sm:$0xff]   ;;  %s287_s7 = scalar_lea.vmem %s180_s6, 128  ;;  %p292_p3 = scmp.lt.s32.totalorder %s180_s6, %s180_s6 }
  0x2a   :  { %vm47_vm0 = vcmp.ge.s32.totalorder %v45_v2, 1  ;;  %vm48_vm1 = vcmp.lt.s32.totalorder %v45_v2, 6  ;;  %vm46_vm4 = vcmp.eq.s32.totalorder %v45_v2, 0  ;;  %p288_p2 = scmp.ne.s32.totalorder %s180_s6, %s287_s7  ;;  %p293_p4 = scmp.lt.s32.totalorder %s287_s7, %s287_s7 }
  0x2b   :  { %vm49_vm2 = vmand %vm47_vm0, %vm48_vm1 }
  0x2c   :  { %v50_v4 = vsel %vm49_vm2, %v43_v3, -inf  ;;  %209 = vmatpush3.bf16.msra.mxu0 %v234_v6  ;;  %p294_p5 = por %p293_p4, %p292_p3 }
  0x2d   :  { %51 = vmax.xlane.f32.xlu0 %v50_v4  ;;  %210 = vmatprep.subr.bf16.mxu0 %v319_v1 }
  0x2e   :  { %p295_p6 = pnand %p294_p5, %p288_p2 }
  0x30   :  { %211 = vmatpush3.bf16.msra.mxu0 %v235_v7 }
  0x31   :  { %212 = vmatprep.subr.bf16.mxu0 %v319_v1 }
  0x34   :  { %213 = vmatpush3.bf16.msra.mxu0 %v236_v8 }
  0x35   :  { %214 = vmatprep.subr.bf16.mxu0 %v319_v1 }
  0x38   :  { %215 = vmatpush3.bf16.msra.mxu0 %v237_v9 }
  0x39   :  { %216 = vmatprep.subr.bf16.mxu0 %v319_v1 }
  0x3c   :  { %217 = vmatpush3.bf16.msra.mxu0 %v238_v10 }
  0x3d   :  { %218 = vmatprep.subr.bf16.mxu0 %v319_v1 }
  0x40   :  { %219 = vmatpush3.bf16.msra.mxu0 %v239_v11 }
  0x41   :  { %220 = vmatprep.subr.bf16.mxu0 %v319_v1 }
  0x44   :  { %221 = vmatpush3.bf16.msra.mxu0 %v240_v12 }
  0xba   :  { %v52_v13 = vpop.xlane.xlu0 %51 }
  0xbb   :  { %v53_v14 = vmul.f32 5.0, %v52_v13  ;;  %v54_v15 = vsub.f32 %v43_v3, %v52_v13 }
  0xbd   :  { %v55_v16 = vsel %vm46_vm4, %v43_v3, %v54_v15  ;;  %v58_v17 = vadd.f32 1e-05, %v53_v14 }
  0xbe   :  { %v56_v18 = vadd.f32 1.0, %v55_v16 }
  0xbf   :  { %241 = vrcp.f32 %v58_v17 }
  0xc0   :  { %v57_v19 = vmax.f32 %v56_v18, 0.0 }
  0xc2   :  { %v61_v20 = vadd.f32 1.0, %v57_v19 }
  0xc4   :  { %v62_v23 = vmul.f32 1e-05, %v61_v20 }
  0xc9   :  { %v242_v21 = vpop.eup %241 }
  0xca   :  { %v60_v22 = vmul.f32 %v242_v21, %v53_v14 }
  0xcc   :  { %v63_v24 = vmul.f32 %v60_v22, %v57_v19 }
  0xce   :  { %v64_v25 = vsel %vm46_vm4, %v62_v23, %v63_v24 }
  0xcf   :  { %v65_v26 = vpack.c.bf16 %v64_v25, %v64_v25 }
  0xd1   :  { %66 = vst [vmem:[#allocation2] sm:$0xf] %v65_v26 }
  0xd8   :  { %v67_v27 = vld [vmem:[#allocation2] sm:$0xf] }
  0xd9   :  { %223 = vmatmul.mubr.bf16.vlgmr.msra.gmra.mrb[0].mxu0 %v67_v27 }
 0x1ac   :  { %v166_v28 = vpop.f32.mrb[0].mxu0 }
 0x1ad   :  { %172 = vst [vmem:[#allocation8] sm:$0xff] %v166_v28  ;;  %v224_v29 = vpop.f32.mrb[1].mxu0 }
 0x1ae   :  { %v169_v30 = vpop.f32.mrb[2].mxu0 }
 0x1af   :  { %298 = shalt.err (!%p295_p6)
}
 0x1b0   :  { %s299_s10 = scalar_lea.hbm %s382_s2, 128 }
 0x1b1   :  { %p300_p7 = scmp.ne.s32.totalorder %s382_s2, %s299_s10  ;;  %p303_p8 = scmp.lt.u32.totalorder %s299_s10, %s382_s2 }
 0x1b3   :  { %p305_p9 = pnand %p303_p8, %p300_p7 }
 0x1b5   :  { %308 = shalt.err (!%p305_p9)
}
 0x1b6   :  { %182 = dma.vmem_to_hbm [thread:$0]  %s180_s6, 128, %s382_s2, [#allocation5]   ;;  %v225_v31 = vpop.f32.mrb[3].mxu0 }
 0x1b7   :  { %313 = dma.done.wait [#allocation5], 128  }
 0x1b8   :  { %314 = vsyncadd [#allocation5], 4294967168 }
 0x1b9   :  { %186 = vsyncpa [#allocation4], 1 }
 0x1ba   :  { %187 = vsyncpa [#allocation7], 1 }
 0x1bb   :  { %188 = vsyncpa [#allocation5], 1 }

</bundles_post_ra>
